<compile_context>
chip_gen: v5e
topology: v5e:2x2
jax: 0.10.0
libtpu: 0.0.40
codegen_flags: <defaults>
</compile_context>

<pallas_src>
import functools

import jax
import jax.numpy as jnp
from jax.experimental import pallas as pl
from jax.experimental.pallas import tpu as pltpu

_STOP_TOKEN = 10
_LANES = 128
_VMEM_BUDGET_BYTES = 24 * 1024 * 1024   # conservative tile budget, fits every gen
_VMEM_LIMIT_BYTES = 32 * 1024 * 1024    # raise v5e's 16 MiB default; no-op on v6e/v7x


def _round_up(x, m):
    return ((x + m - 1) // m) * m


def _num_tensorcores() -> int:
    """2 on devices exposing two TensorCores (v4/v5p megacore, v7x); else 1."""
    try:
        kind = jax.devices()[0].device_kind.lower()
    except Exception:
        return 1
    if any(tag in kind for tag in ("v4", "v5p", "v7", "7x")):
        return 2
    return 1


def _pick_block_b(block_b, batch, positions, classes, itemsize):
    """Largest 128-multiple batch tile that fits a conservative VMEM budget."""
    bt = _round_up(min(block_b, max(batch, 1)), _LANES)
    # Per-lane VMEM bytes: double-buffered logits + labels (pipeline buffers)
    # plus ~6 f32 [P, C, bt]-sized Mosaic temporaries for the fused body
    # (f32 upcast / exp / iota / one-hot select).
    # TODO(synk): strip-mine the body over lane chunks with lax.fori_loop if a
    # bundle dump ever shows VMEM temp spills; that would let bt grow to
    # 16K-32K while keeping one big DMA tile per grid step.
    per_lane = (2 * (positions * classes * itemsize + positions * 4)
                + 4 * positions
                + 6 * positions * classes * 4)
    cap = max(_LANES, (_VMEM_BUDGET_BYTES // per_lane) // _LANES * _LANES)
    return min(bt, cap)


def _mask_ce_kernel(pred_ref, label_ref, acc_ref, cnt_ref, *,
                    batch: int, block_b: int, tiles_per_core: int):
    """One (P, C, Bt) tile of logits -> accumulate masked-CE sum & nonzero count.

    pred_ref : [P, C, Bt]  logits (native dtype; math in f32)
    label_ref: [P, Bt]     int32 class ids (10 == stop token)
    acc_ref  : [1, 1, Bt]  f32 running sum of masked CE   (per parallel core)
    cnt_ref  : [1, 1, Bt]  f32 running count of nonzero masked CE entries
    """
    core = pl.program_id(0)
    step = pl.program_id(1)

    @pl.when(step == 0)
    def _init():
        acc_ref[...] = jnp.zeros_like(acc_ref)
        cnt_ref[...] = jnp.zeros_like(cnt_ref)

    pred_nat = pred_ref[...]                       # [P, C, Bt] native dtype
    pred = pred_nat.astype(jnp.float32)            # [P, C, Bt] f32 math
    label = label_ref[...]                         # [P, Bt] int32
    positions, classes, bt = pred.shape

    # ---- "characters + one stop token" mask; lanes past the real batch
    #      (ragged tail of the last block, or duplicate clamped blocks) off ----
    stop = jnp.sum((label != _STOP_TOKEN).astype(jnp.int32),
                   axis=0, keepdims=True) + 1                                # [1, Bt]
    pos = jax.lax.broadcasted_iota(jnp.int32, (positions, bt), 0)            # [P, Bt]
    tile_base = (core * tiles_per_core + step) * block_b                     # unclamped
    b_idx = tile_base + jax.lax.broadcasted_iota(jnp.int32, (positions, bt), 1)
    keep = jnp.logical_and(pos < stop, b_idx < batch)                        # [P, Bt]

    # ---- cross entropy per (position, lane): logsumexp(f32) - target logit ----
    m = jnp.max(pred, axis=1, keepdims=True)                                 # [P, 1, Bt]
    lse = jnp.log(jnp.sum(jnp.exp(pred - m), axis=1)) + m[:, 0, :]           # [P, Bt]

    # one-hot gather in the input dtype (exact: the sum has a single nonzero term)
    cls = jax.lax.broadcasted_iota(jnp.int32, (positions, classes, bt), 1)   # [P, C, Bt]
    zero = jnp.zeros((), pred_nat.dtype)
    tgt = jnp.sum(jnp.where(cls == label[:, None, :], pred_nat, zero),
                  axis=1).astype(jnp.float32)                                # [P, Bt]

    # select, never multiply: OOB-lane garbage (inf/NaN) cannot poison the sums
    masked = jnp.where(keep, lse - tgt, 0.0)                                 # [P, Bt]

    # ---- fold the position axis here so the resident per-core accumulators
    #      (and their load/store traffic) are only [1, Bt] ----
    acc_ref[...] += jnp.sum(masked, axis=0)[None, None, :]
    cnt_ref[...] += jnp.sum((masked != 0.0).astype(jnp.float32),
                            axis=0)[None, None, :]


def mask_ce_loss(pred, label, average=True, *, block_b=8192):
    """pred: [B, 4, C] float logits (f32 or bf16), label: [B, 4] int ids (10 = stop)."""
    B, P, C = pred.shape
    label = label.astype(jnp.int32)

    # Lane-dense relayout only (no pad): batch rides the 128-wide lane axis.
    # This is the single remaining HBM copy of pred ahead of the kernel's read.
    # TODO(synk): emit logits as [P, C, B] upstream (or experiment with
    # CompilerParams(allow_input_fusion=...)) to remove this copy as well.
    pred_t = jnp.transpose(pred, (1, 2, 0))          # [P, C, B]
    label_t = jnp.transpose(label, (1, 0))           # [P, B]

    bt = _pick_block_b(block_b, B, P, C, jnp.dtype(pred.dtype).itemsize)
    tiles = pl.cdiv(B, bt)                           # ragged tail handled in-kernel
    num_cores = max(1, min(_num_tensorcores(), tiles))
    tiles_per_core = pl.cdiv(tiles, num_cores)
    last_blk = tiles - 1

    # Clamp so no grid step maps to a fully out-of-bounds DMA window.  Clamped
    # (duplicate) blocks contribute nothing: the kernel masks on the UNCLAMPED
    # logical batch index, which is >= B for those steps.
    def pred_map(c, i):
        return (0, 0, jnp.minimum(c * tiles_per_core + i, last_blk))

    def label_map(c, i):
        return (0, jnp.minimum(c * tiles_per_core + i, last_blk))

    kernel = functools.partial(_mask_ce_kernel, batch=B, block_b=bt,
                               tiles_per_core=tiles_per_core)

    acc, cnt = pl.pallas_call(
        kernel,
        out_shape=(jax.ShapeDtypeStruct((num_cores, 1, bt), jnp.float32),
                   jax.ShapeDtypeStruct((num_cores, 1, bt), jnp.float32)),
        grid_spec=pltpu.PrefetchScalarGridSpec(
            num_scalar_prefetch=0,
            grid=(num_cores, tiles_per_core),
            in_specs=[
                pl.BlockSpec((P, C, bt), pred_map),
                pl.BlockSpec((P, bt), label_map),
            ],
            out_specs=[
                pl.BlockSpec((1, 1, bt), lambda c, i: (c, 0, 0)),
                pl.BlockSpec((1, 1, bt), lambda c, i: (c, 0, 0)),
            ],
        ),
        compiler_params=pltpu.CompilerParams(
            dimension_semantics=("parallel", "arbitrary"),
            vmem_limit_bytes=_VMEM_LIMIT_BYTES),
    )(pred_t, label_t)

    total = jnp.sum(acc)
    count = jnp.sum(cnt)
    # NOTE: count == 0 -> NaN, matching PyTorch's loss_final[loss_final != 0].mean()
    # on an empty selection.
    return total / count if average else total


def _reference(pred, label, average=True):
    # Pure-JAX reference mirroring the PyTorch maskloss semantics.
    pred = pred.astype(jnp.float32)
    label = label.astype(jnp.int32)
    B, P, C = pred.shape
    lse = jax.nn.logsumexp(pred, axis=-1)                                   # [B, P]
    tgt = jnp.take_along_axis(pred, label[:, :, None], axis=-1)[..., 0]     # [B, P]
    ce = lse - tgt
    stop_index = jnp.sum(label != _STOP_TOKEN, axis=-1) + 1
    pos = jnp.arange(P)[None, :]
    mask = (pos < stop_index[:, None]).astype(jnp.float32)
    masked = ce * mask
    total = jnp.sum(masked)
    count = jnp.sum(masked != 0.0)
    return total / count if average else total


if __name__ == "__main__":
    key = jax.random.PRNGKey(0)
    k_pred, k_label = jax.random.split(key)

    B, P, C = 8, 4, 16  # batch, positions, classes (labels in [0, 10], 10 = stop)
    pred = jax.random.normal(k_pred, (B, P, C), dtype=jnp.float32)
    label = jax.random.randint(k_label, (B, P), minval=0, maxval=11, dtype=jnp.int32)

    loss_avg_fn = jax.jit(lambda p, l: mask_ce_loss(p, l, average=True))
    loss_sum_fn = jax.jit(lambda p, l: mask_ce_loss(p, l, average=False))

    loss_avg = jax.block_until_ready(loss_avg_fn(pred, label))
    loss_sum = jax.block_until_ready(loss_sum_fn(pred, label))
    ref_avg = _reference(pred, label, True)
    ref_sum = _reference(pred, label, False)
    assert jnp.allclose(loss_avg, ref_avg, rtol=1e-5, atol=1e-5), (loss_avg, ref_avg)
    assert jnp.allclose(loss_sum, ref_sum, rtol=1e-5, atol=1e-5), (loss_sum, ref_sum)

    # bf16 logits are fed straight to the kernel (no pre-upcast); math is f32 inside.
    pred_bf16 = pred.astype(jnp.bfloat16)
    loss_bf16 = jax.block_until_ready(loss_avg_fn(pred_bf16, label))
    ref_bf16 = _reference(pred_bf16, label, True)
    assert jnp.allclose(loss_bf16, ref_bf16, rtol=1e-4, atol=1e-4), (loss_bf16, ref_bf16)

    print("KERNEL_OK")
</pallas_src>

<mosaic_0001>
module attributes {stable_mosaic.version = 11 : i64} {
  func.func @_mask_ce_kernel(%arg0: i32, %arg1: i32, %arg2: memref<4x16x128xf32, #tpu.memory_space<vmem>>, %arg3: memref<4x128xi32, #tpu.memory_space<vmem>>, %arg4: memref<1x1x128xf32, #tpu.memory_space<vmem>>, %arg5: memref<1x1x128xf32, #tpu.memory_space<vmem>>) attributes {dimension_semantics = [#tpu.dimension_semantics<parallel>, #tpu.dimension_semantics<arbitrary>], iteration_bounds = array<i64: 1, 1>, scalar_prefetch = 0 : i64, scratch_operands = 0 : i64, tpu.core_type = #tpu.core_type<tc>, window_params = [{transform_indices = @transform_0, window_bounds = array<i64: 4, 16, 128>}, {transform_indices = @transform_1, window_bounds = array<i64: 4, 128>}, {transform_indices = @transform_2, window_bounds = array<i64: 1, 1, 128>}, {transform_indices = @transform_3, window_bounds = array<i64: 1, 1, 128>}]} {
    %c0_i32 = arith.constant 0 : i32
    %0 = arith.cmpi eq, %arg1, %c0_i32 : i32
    %1 = arith.extui %0 : i1 to i32
    %c0_i32_0 = arith.constant 0 : i32
    %2 = arith.cmpi ne, %1, %c0_i32_0 : i32
    scf.if %2 {
      %cst_26 = arith.constant 0.000000e+00 : f32
      %57 = vector.broadcast %cst_26 : f32 to vector<1x1x128xf32>
      %c0_27 = arith.constant 0 : index
      %c0_28 = arith.constant 0 : index
      %c0_29 = arith.constant 0 : index
      %58 = vector.load %arg4[%c0_27, %c0_28, %c0_29] : memref<1x1x128xf32, #tpu.memory_space<vmem>>, vector<1x1x128xf32>
      tpu.vector_store %arg4[%c0_27, %c0_28, %c0_29], %57 {strides = array<i32>} : memref<1x1x128xf32, #tpu.memory_space<vmem>>, vector<1x1x128xf32>,
      %cst_30 = arith.constant 0.000000e+00 : f32
      %59 = vector.broadcast %cst_30 : f32 to vector<1x1x128xf32>
      %c0_31 = arith.constant 0 : index
      %c0_32 = arith.constant 0 : index
      %c0_33 = arith.constant 0 : index
      %60 = vector.load %arg5[%c0_31, %c0_32, %c0_33] : memref<1x1x128xf32, #tpu.memory_space<vmem>>, vector<1x1x128xf32>
      tpu.vector_store %arg5[%c0_31, %c0_32, %c0_33], %59 {strides = array<i32>} : memref<1x1x128xf32, #tpu.memory_space<vmem>>, vector<1x1x128xf32>,
    } else {
    }
    %c0 = arith.constant 0 : index
    %c0_1 = arith.constant 0 : index
    %c0_2 = arith.constant 0 : index
    %3 = vector.load %arg2[%c0, %c0_1, %c0_2] : memref<4x16x128xf32, #tpu.memory_space<vmem>>, vector<4x16x128xf32>
    %c0_3 = arith.constant 0 : index
    %c0_4 = arith.constant 0 : index
    %4 = vector.load %arg3[%c0_3, %c0_4] : memref<4x128xi32, #tpu.memory_space<vmem>>, vector<4x128xi32>
    %c10_i32 = arith.constant 10 : i32
    %5 = vector.broadcast %c10_i32 : i32 to vector<4x128xi32>
    %6 = arith.cmpi ne, %4, %5 : vector<4x128xi32>
    %7 = arith.extui %6 : vector<4x128xi1> to vector<4x128xi32>
    %cst = arith.constant dense<0> : vector<128xi32>
    %8 = vector.multi_reduction <add>, %7, %cst [0] : vector<4x128xi32> to vector<128xi32>
    %9 = vector.shape_cast %8 : vector<128xi32> to vector<1x128xi32>
    %c1_i32 = arith.constant 1 : i32
    %10 = vector.broadcast %c1_i32 : i32 to vector<1x128xi32>
    %11 = arith.addi %9, %10 : vector<1x128xi32>
    %12 = tpu.iota {dimensions = array<i32: 0>} : vector<4x128xi32>
    %c1_i32_5 = arith.constant 1 : i32
    %13 = arith.muli %arg0, %c1_i32_5 : i32
    %14 = arith.addi %13, %arg1 : i32
    %c128_i32 = arith.constant 128 : i32
    %15 = arith.muli %14, %c128_i32 : i32
    %16 = tpu.iota {dimensions = array<i32: 1>} : vector<4x128xi32>
    %17 = vector.broadcast %15 : i32 to vector<4x128xi32>
    %18 = arith.addi %17, %16 : vector<4x128xi32>
    %19 = vector.broadcast %11 : vector<1x128xi32> to vector<4x128xi32>
    %20 = arith.cmpi slt, %12, %19 : vector<4x128xi32>
    %c8_i32 = arith.constant 8 : i32
    %21 = vector.broadcast %c8_i32 : i32 to vector<4x128xi32>
    %22 = arith.cmpi slt, %18, %21 : vector<4x128xi32>
    %23 = arith.andi %20, %22 : vector<4x128xi1>
    %cst_6 = arith.constant dense<0xFF800000> : vector<4x128xf32>
    %24 = vector.multi_reduction <maximumf>, %3, %cst_6 [1] : vector<4x16x128xf32> to vector<4x128xf32>
    %25 = vector.shape_cast %24 : vector<4x128xf32> to vector<4x1x128xf32>
    %26 = vector.broadcast %25 : vector<4x1x128xf32> to vector<4x16x128xf32>
    %27 = arith.subf %3, %26 : vector<4x16x128xf32>
    %28 = math.exp %27 : vector<4x16x128xf32>
    %cst_7 = arith.constant dense<0.000000e+00> : vector<4x128xf32>
    %29 = vector.multi_reduction <add>, %28, %cst_7 [1] : vector<4x16x128xf32> to vector<4x128xf32>
    %30 = math.log %29 : vector<4x128xf32>
    %31 = vector.shape_cast %25 : vector<4x1x128xf32> to vector<4x128xf32>
    %32 = arith.addf %30, %31 : vector<4x128xf32>
    %33 = tpu.iota {dimensions = array<i32: 1>} : vector<4x16x128xi32>
    %34 = vector.shape_cast %4 : vector<4x128xi32> to vector<4x1x128xi32>
    %35 = vector.broadcast %34 : vector<4x1x128xi32> to vector<4x16x128xi32>
    %36 = arith.cmpi eq, %33, %35 : vector<4x16x128xi32>
    %cst_8 = arith.constant 0.000000e+00 : f32
    %37 = vector.broadcast %cst_8 : f32 to vector<4x16x128xf32>
    %38 = arith.select %36, %3, %37 : vector<4x16x128xi1>, vector<4x16x128xf32>
    %cst_9 = arith.constant dense<0.000000e+00> : vector<4x128xf32>
    %39 = vector.multi_reduction <add>, %38, %cst_9 [1] : vector<4x16x128xf32> to vector<4x128xf32>
    %40 = arith.subf %32, %39 : vector<4x128xf32>
    %cst_10 = arith.constant 0.000000e+00 : f32
    %41 = vector.broadcast %cst_10 : f32 to vector<4x128xf32>
    %42 = arith.select %23, %40, %41 : vector<4x128xi1>, vector<4x128xf32>
    %c0_11 = arith.constant 0 : index
    %c0_12 = arith.constant 0 : index
    %c0_13 = arith.constant 0 : index
    %43 = vector.load %arg4[%c0_11, %c0_12, %c0_13] : memref<1x1x128xf32, #tpu.memory_space<vmem>>, vector<1x1x128xf32>
    %cst_14 = arith.constant dense<0.000000e+00> : vector<128xf32>
    %44 = vector.multi_reduction <add>, %42, %cst_14 [0] : vector<4x128xf32> to vector<128xf32>
    %45 = vector.shape_cast %44 : vector<128xf32> to vector<1x1x128xf32>
    %46 = arith.addf %43, %45 : vector<1x1x128xf32>
    %c0_15 = arith.constant 0 : index
    %c0_16 = arith.constant 0 : index
    %c0_17 = arith.constant 0 : index
    %47 = vector.load %arg4[%c0_15, %c0_16, %c0_17] : memref<1x1x128xf32, #tpu.memory_space<vmem>>, vector<1x1x128xf32>
    tpu.vector_store %arg4[%c0_15, %c0_16, %c0_17], %46 {strides = array<i32>} : memref<1x1x128xf32, #tpu.memory_space<vmem>>, vector<1x1x128xf32>,
    %c0_18 = arith.constant 0 : index
    %c0_19 = arith.constant 0 : index
    %c0_20 = arith.constant 0 : index
    %48 = vector.load %arg5[%c0_18, %c0_19, %c0_20] : memref<1x1x128xf32, #tpu.memory_space<vmem>>, vector<1x1x128xf32>
    %cst_21 = arith.constant 0.000000e+00 : f32
    %49 = vector.broadcast %cst_21 : f32 to vector<4x128xf32>
    %50 = arith.cmpf one, %42, %49 : vector<4x128xf32>
    %51 = arith.extui %50 : vector<4x128xi1> to vector<4x128xi32>
    %52 = arith.sitofp %51 : vector<4x128xi32> to vector<4x128xf32>
    %cst_22 = arith.constant dense<0.000000e+00> : vector<128xf32>
    %53 = vector.multi_reduction <add>, %52, %cst_22 [0] : vector<4x128xf32> to vector<128xf32>
    %54 = vector.shape_cast %53 : vector<128xf32> to vector<1x1x128xf32>
    %55 = arith.addf %48, %54 : vector<1x1x128xf32>
    %c0_23 = arith.constant 0 : index
    %c0_24 = arith.constant 0 : index
    %c0_25 = arith.constant 0 : index
    %56 = vector.load %arg5[%c0_23, %c0_24, %c0_25] : memref<1x1x128xf32, #tpu.memory_space<vmem>>, vector<1x1x128xf32>
    tpu.vector_store %arg5[%c0_23, %c0_24, %c0_25], %55 {strides = array<i32>} : memref<1x1x128xf32, #tpu.memory_space<vmem>>, vector<1x1x128xf32>,
    return
  }
  func.func @transform_0(%arg0: i32, %arg1: i32) -> (i32, i32, i32) {
    %c1_i32 = arith.constant 1 : i32
    %0 = arith.muli %arg0, %c1_i32 : i32
    %1 = arith.addi %0, %arg1 : i32
    %c0_i32 = arith.constant 0 : i32
    %2 = arith.minsi %1, %c0_i32 : i32
    %c0_i32_0 = arith.constant 0 : i32
    %c0_i32_1 = arith.constant 0 : i32
    %c0_i32_2 = arith.constant 0 : i32
    return %c0_i32_0, %c0_i32_1, %2 : i32, i32, i32
  }
  func.func @transform_1(%arg0: i32, %arg1: i32) -> (i32, i32) {
    %c1_i32 = arith.constant 1 : i32
    %0 = arith.muli %arg0, %c1_i32 : i32
    %1 = arith.addi %0, %arg1 : i32
    %c0_i32 = arith.constant 0 : i32
    %2 = arith.minsi %1, %c0_i32 : i32
    %c0_i32_0 = arith.constant 0 : i32
    %c0_i32_1 = arith.constant 0 : i32
    return %c0_i32_0, %2 : i32, i32
  }
  func.func @transform_2(%arg0: i32, %arg1: i32) -> (i32, i32, i32) {
    %c0_i32 = arith.constant 0 : i32
    %c0_i32_0 = arith.constant 0 : i32
    %c0_i32_1 = arith.constant 0 : i32
    return %arg0, %c0_i32, %c0_i32_0 : i32, i32, i32
  }
  func.func @transform_3(%arg0: i32, %arg1: i32) -> (i32, i32, i32) {
    %c0_i32 = arith.constant 0 : i32
    %c0_i32_0 = arith.constant 0 : i32
    %c0_i32_1 = arith.constant 0 : i32
    return %arg0, %c0_i32, %c0_i32_0 : i32, i32, i32
  }
}

</mosaic_0001>

<bundles_post_ra>
// kernel: _lambda_.1
= control target key start
LH: loop header
LB: loop body
LE: loop exit
PB: predicated region body
PF: predicated region fallthrough
CT: control target
= control target key end

     0   :  { %v334_v0 = vmov 0.0   ;;  %v93_v18 = vlaneseq  ;;  %vm84_vm1 = vcmask 1043456   ;;  %v335_v37 = vmov 0   ;;  %s489_s0 = inlined_call_operand.vmem [shape: f32[4,16,8], index: 0, kind: input, shape index: {}]   ;;  %s490_s2 = inlined_call_operand.vmem [shape: f32[1,1,128], index: 2, kind: output, shape index: {0}]   ;;  %s491_s3 = inlined_call_operand.vmem [shape: f32[1,1,128], index: 3, kind: output, shape index: {1}]   ;;  %s492_s1 = inlined_call_operand.vmem [shape: s32[4,8], index: 1, kind: input, shape index: {}]  }
   0x1   :  { %71 = vst [vmem:[%s490_s2] sm:$0x1] %v334_v0  ;;  %v363_v1 = vld [vmem:[%s489_s0] sm:$0xff]  ;;  %v368_v2 = vld [vmem:[%s489_s0 + $0x8] sm:$0xff]  ;;  %v373_v3 = vld [vmem:[%s489_s0 + $0x10] sm:$0xff]  ;;  %vm256_vm10 = vcmask 1041409   ;;  %vm258_vm13 = vcmask 1042434  }
   0x2   :  { %v378_v4 = vld [vmem:[%s489_s0 + $0x18] sm:$0xff]  ;;  %v383_v5 = vld [vmem:[%s489_s0 + $0x20] sm:$0xff]  ;;  %v388_v6 = vld [vmem:[%s489_s0 + $0x28] sm:$0xff]  ;;  %v104_v7 = vmax.f32 %v363_v1, %v368_v2  ;;  %72 = vst [vmem:[%s491_s3] sm:$0x1] %v334_v0  ;;  %v416_v28 = vshrl.u32 %v93_v18, 7  ;;  %vm260_vm14 = vcmask 1043459  }
   0x3   :  { %v399_v8 = vld [vmem:[%s489_s0 + $0x30] sm:$0xff]  ;;  %v404_v9 = vld [vmem:[%s489_s0 + $0x38] sm:$0xff]  ;;  %v111_v10 = vmax.f32 %v373_v3, %v378_v4  ;;  %v118_v11 = vmax.f32 %v383_v5, %v388_v6  ;;  %v81_v23 = vld [vmem:[%s492_s1] sm:$0xf] }
   0x4   :  { %v105_v12 = vrot.slane %v104_v7, 4  ;;  %v125_v13 = vmax.f32 %v399_v8, %v404_v9  ;;  %vm82_vm0 = vcmp.ne.s32.totalorder %v81_v23, 10  ;;  %v197_v33 = vrot.slane %v81_v23, 1 }
   0x5   :  { %v112_v14 = vrot.slane %v111_v10, 4  ;;  %v119_v15 = vrot.slane %v118_v11, 4  ;;  %v198_v36 = vrot.slane %v81_v23, 2  ;;  %v83_v38 = vsel %vm82_vm0, 1, %v335_v37 }
   0x6   :  { %v106_v16 = vmax.f32 %v104_v7, %v105_v12  ;;  %v126_v17 = vrot.slane %v125_v13, 4  ;;  %v200_v41 = vperm.slane %v81_v23, 0  ;;  %v196_v44 = vadd.s32 8, %v416_v28 }
   0x7   :  { %v113_v19 = vmax.f32 %v111_v10, %v112_v14  ;;  %v120_v20 = vmax.f32 %v118_v11, %v119_v15  ;;  %v199_v45 = vrot.slane %v81_v23, 3  ;;  %v201_v49 = vperm.slane %v197_v33, 0 }
   0x8   :  { %v107_v21 = vrot.slane %v106_v16, 2  ;;  %v127_v22 = vmax.f32 %v125_v13, %v126_v17  ;;  %v202_v53 = vperm.slane %v198_v36, 0  ;;  %vm442_vm2 = vcmp.eq.s32.totalorder %v416_v28, %v200_v41 }
   0x9   :  { %v114_v24 = vrot.slane %v113_v19, 2  ;;  %v121_v25 = vrot.slane %v120_v20, 2  ;;  %vm448_vm3 = vcmp.eq.s32.totalorder %v196_v44, %v200_v41  ;;  %v203_v7 = vperm.slane %v199_v45, 0 }
   0xa   :  { %v108_v26 = vmax.f32 %v106_v16, %v107_v21  ;;  %v128_v27 = vrot.slane %v127_v22, 2  ;;  %vm206_vm4 = vcmp.eq.s32.totalorder %v416_v28, %v201_v49  ;;  %vm207_vm5 = vcmp.eq.s32.totalorder %v196_v44, %v201_v49 }
   0xb   :  { %v115_v29 = vmax.f32 %v113_v19, %v114_v24  ;;  %v122_v30 = vmax.f32 %v120_v20, %v121_v25  ;;  %v212_v12 = vsel %vm442_vm2, %v363_v1, 0.0  ;;  %v213_v13 = vsel %vm448_vm3, %v368_v2, 0.0 }
   0xc   :  { %v109_v31 = vrot.slane %v108_v26, 1  ;;  %v129_v32 = vmax.f32 %v127_v22, %v128_v27  ;;  %vm208_vm6 = vcmp.eq.s32.totalorder %v416_v28, %v202_v53  ;;  %vm209_vm7 = vcmp.eq.s32.totalorder %v196_v44, %v202_v53 }
   0xd   :  { %v116_v34 = vrot.slane %v115_v29, 1  ;;  %v123_v35 = vrot.slane %v122_v30, 1  ;;  %v85_v15 = vsel %vm84_vm1, %v83_v38, 0  ;;  %v214_v16 = vsel %vm206_vm4, %v373_v3, 0.0 }
   0xe   :  { %v418_v39 = vmax.f32 %v108_v26, %v109_v31  ;;  %v130_v40 = vrot.slane %v129_v32, 1  ;;  %v215_v17 = vsel %vm207_vm5, %v378_v4, 0.0  ;;  %vm210_vm8 = vcmp.eq.s32.totalorder %v416_v28, %v203_v7 }
   0xf   :  { %v420_v42 = vmax.f32 %v115_v29, %v116_v34  ;;  %v422_v43 = vmax.f32 %v122_v30, %v123_v35  ;;  %vm211_vm9 = vcmp.eq.s32.totalorder %v196_v44, %v203_v7  ;;  %v217_v20 = vsel %vm209_vm7, %v388_v6, 0.0 }
  0x10   :  { %v425_v46 = vmax.f32 %v129_v32, %v130_v40  ;;  %v132_v47 = vsub.f32 %v363_v1, %v418_v39  ;;  %v133_v48 = vsub.f32 %v368_v2, %v418_v39  ;;  %v220_v1 = vadd.f32 %v213_v13, %v212_v12 }
  0x11   :  { %v134_v50 = vsub.f32 %v373_v3, %v420_v42  ;;  %v135_v51 = vsub.f32 %v378_v4, %v420_v42  ;;  %v136_v52 = vsub.f32 %v383_v5, %v422_v43  ;;  %v137_v54 = vsub.f32 %v388_v6, %v422_v43 }
  0x12   :  { %v138_v55 = vsub.f32 %v399_v8, %v425_v46  ;;  %v140_v56 = vmul.f32 1.442695, %v132_v47  ;;  %v139_v58 = vsub.f32 %v404_v9, %v425_v46  ;;  %v142_v59 = vmul.f32 1.442695, %v133_v48 }
  0x13   :  { %v144_v60 = vmul.f32 1.442695, %v134_v50  ;;  %v146_v62 = vmul.f32 1.442695, %v135_v51  ;;  %v148_v63 = vmul.f32 1.442695, %v136_v52  ;;  %v227_v23 = vadd.f32 %v215_v17, %v214_v16 }
  0x14   :  { %310 = vpow2.f32 %v140_v56  ;;  %v150_v10 = vmul.f32 1.442695, %v137_v54  ;;  %v152_v11 = vmul.f32 1.442695, %v138_v55  ;;  %v154_v14 = vmul.f32 1.442695, %v139_v58 }
  0x15   :  { %312 = vpow2.f32 %v142_v59  ;;  %v216_v2 = vsel %vm208_vm6, %v383_v5, 0.0  ;;  %v86_v22 = vrot.slane %v85_v15, 4  ;;  %v218_v3 = vsel %vm210_vm8, %v399_v8, 0.0 }
  0x16   :  { %314 = vpow2.f32 %v144_v60  ;;  %v219_v4 = vsel %vm211_vm9, %v404_v9, 0.0  ;;  %v221_v27 = vrot.slane %v220_v1, 4  ;;  %v234_v29 = vadd.f32 %v217_v20, %v216_v2 }
  0x17   :  { %316 = vpow2.f32 %v146_v62  ;;  %v87_v5 = vadd.s32 %v86_v22, %v85_v15  ;;  %v228_v34 = vrot.slane %v227_v23, 4  ;;  %v241_v6 = vadd.f32 %v219_v4, %v218_v3 }
  0x18   :  { %318 = vpow2.f32 %v148_v63  ;;  %v222_v41 = vadd.f32 %v221_v27, %v220_v1  ;;  %v235_v44 = vrot.slane %v234_v29, 4 }
  0x19   :  { %320 = vpow2.f32 %v150_v10  ;;  %v88_v48 = vrot.slane %v87_v5, 2  ;;  %v229_v49 = vadd.f32 %v228_v34, %v227_v23  ;;  %v242_v50 = vrot.slane %v241_v6, 4 }
  0x1a   :  { %v311_v19 = vpop.eup %310  ;;  %322 = vpow2.f32 %v152_v11  ;;  %v223_v55 = vrot.slane %v222_v41, 2  ;;  %v236_v56 = vadd.f32 %v235_v44, %v234_v29 }
  0x1b   :  { %v313_v21 = vpop.eup %312  ;;  %324 = vpow2.f32 %v154_v14  ;;  %v89_v61 = vadd.s32 %v88_v48, %v87_v5  ;;  %v230_v62 = vrot.slane %v229_v49, 2  ;;  %v243_v63 = vadd.f32 %v242_v50, %v241_v6 }
  0x1c   :  { %v315_v24 = vpop.eup %314  ;;  %v156_v25 = vadd.f32 %v313_v21, %v311_v19  ;;  %v224_v13 = vadd.f32 %v223_v55, %v222_v41  ;;  %v237_v14 = vrot.slane %v236_v56, 2 }
  0x1d   :  { %v317_v26 = vpop.eup %316  ;;  %v231_v1 = vadd.f32 %v230_v62, %v229_v49  ;;  %v244_v19 = vrot.slane %v243_v63, 2  ;;  %v90_v2 = vrot.slane %v89_v61, 1 }
  0x1e   :  { %v319_v30 = vpop.eup %318  ;;  %v157_v31 = vrot.slane %v156_v25, 4  ;;  %v163_v32 = vadd.f32 %v317_v26, %v315_v24  ;;  %v225_v22 = vrot.slane %v224_v13, 1  ;;  %v238_v23 = vadd.f32 %v237_v14, %v236_v56 }
  0x1f   :  { %v321_v33 = vpop.eup %320  ;;  %v245_v3 = vadd.f32 %v244_v19, %v243_v63  ;;  %v91_v26 = vadd.s32 %v90_v2, %v89_v61  ;;  %v264_v61 = vld [vmem:[%s490_s2] sm:$0x1] }
  0x20   :  { %v323_v35 = vpop.eup %322  ;;  %v158_v36 = vadd.f32 %v157_v31, %v156_v25  ;;  %v164_v37 = vrot.slane %v163_v32, 4  ;;  %v170_v38 = vadd.f32 %v321_v33, %v319_v30  ;;  %v232_v25 = vrot.slane %v231_v1, 1 }
  0x21   :  { %v325_v40 = vpop.eup %324  ;;  %v226_v29 = vadd.f32 %v225_v22, %v224_v13  ;;  %v239_v30 = vrot.slane %v238_v23, 1  ;;  %v246_v34 = vrot.slane %v245_v3, 1 }
  0x22   :  { %v159_v8 = vrot.slane %v158_v36, 2  ;;  %v165_v45 = vadd.f32 %v164_v37, %v163_v32  ;;  %v171_v9 = vrot.slane %v170_v38, 4  ;;  %v177_v47 = vadd.f32 %v325_v40, %v323_v35 }
  0x23   :  { %v233_v5 = vadd.f32 %v232_v25, %v231_v1  ;;  %v92_v35 = vadd.s32 1, %v91_v26  ;;  %v240_v40 = vadd.f32 %v239_v30, %v238_v23 }
  0x24   :  { %v160_v51 = vadd.f32 %v159_v8, %v158_v36  ;;  %v166_v52 = vrot.slane %v165_v45, 2  ;;  %v172_v53 = vadd.f32 %v171_v9, %v170_v38  ;;  %v178_v54 = vrot.slane %v177_v47, 4 }
  0x25   :  { %v98_v36 = vand.u32 127, %v93_v18  ;;  %v247_v9 = vadd.f32 %v246_v34, %v245_v3  ;;  %vm101_vm11 = vcmp.lt.s32.totalorder %v416_v28, %v92_v35 }
  0x26   :  { %v161_v57 = vrot.slane %v160_v51, 1  ;;  %v167_v58 = vadd.f32 %v166_v52, %v165_v45  ;;  %v173_v59 = vrot.slane %v172_v53, 2  ;;  %v179_v60 = vadd.f32 %v178_v54, %v177_v47 }
  0x27   :  { %vm102_vm12 = vcmp.lt.s32.totalorder %v98_v36, 8 }
  0x28   :  { %v162_v7 = vadd.f32 %v161_v57, %v160_v51  ;;  %v168_v10 = vrot.slane %v167_v58, 1  ;;  %v174_v11 = vadd.f32 %v173_v59, %v172_v53  ;;  %v180_v12 = vrot.slane %v179_v60, 2  ;;  %vm103_vm15 = vmand %vm101_vm11, %vm102_vm12 }
  0x2a   :  { %v169_v15 = vadd.f32 %v168_v10, %v167_v58  ;;  %v175_v16 = vrot.slane %v174_v11, 1  ;;  %v181_v17 = vadd.f32 %v180_v12, %v179_v60  ;;  %326 = vlog2.f32 %v162_v7 }
  0x2c   :  { %v176_v20 = vadd.f32 %v175_v16, %v174_v11  ;;  %v182_v21 = vrot.slane %v181_v17, 1  ;;  %328 = vlog2.f32 %v169_v15 }
  0x2e   :  { %v183_v24 = vadd.f32 %v182_v21, %v181_v17  ;;  %330 = vlog2.f32 %v176_v20 }
  0x30   :  { %v327_v4 = vpop.eup %326  ;;  %332 = vlog2.f32 %v183_v24 }
  0x31   :  { %v185_v27 = vmul.f32 0.6931472, %v327_v4 }
  0x32   :  { %v329_v31 = vpop.eup %328 }
  0x33   :  { %v187_v32 = vmul.f32 0.6931472, %v329_v31  ;;  %v192_v33 = vadd.f32 %v185_v27, %v418_v39 }
  0x34   :  { %v331_v6 = vpop.eup %330 }
  0x35   :  { %v189_v37 = vmul.f32 0.6931472, %v331_v6  ;;  %v193_v38 = vadd.f32 %v187_v32, %v420_v42  ;;  %v248_v41 = vsub.f32 %v192_v33, %v226_v29 }
  0x36   :  { %v333_v44 = vpop.eup %332 }
  0x37   :  { %v191_v8 = vmul.f32 0.6931472, %v333_v44  ;;  %v194_v45 = vadd.f32 %v189_v37, %v422_v43  ;;  %v249_v47 = vsub.f32 %v193_v38, %v233_v5 }
  0x39   :  { %v195_v39 = vadd.f32 %v191_v8, %v425_v46  ;;  %v250_v48 = vsub.f32 %v194_v45, %v240_v40  ;;  %v257_v18 = vsel %vm256_vm10, %v249_v47, %v248_v41 }
  0x3b   :  { %v251_v42 = vsub.f32 %v195_v39, %v247_v9  ;;  %v259_v49 = vsel %vm258_vm13, %v250_v48, %v257_v18 }
  0x3d   :  { %v261_v50 = vsel %vm260_vm14, %v251_v42, %v259_v49 }
  0x3e   :  { %v263_v51 = vsel %vm103_vm15, %v261_v50, 0.0 }
  0x3f   :  { %v265_v52 = vsel %vm84_vm1, %v263_v51, 0.0  ;;  %vm275_vm0 = vcmp.ne.f32.partialorder %v263_v51, 0.0 }
  0x40   :  { %v266_v43 = vrot.slane %v265_v52, 4  ;;  %v307_v53 = vsel %vm275_vm0, 1.0, %v334_v0  ;;  %v274_v0 = vld [vmem:[%s491_s3] sm:$0x1] }
  0x41   :  { %v278_v28 = vsel %vm84_vm1, %v307_v53, 0.0 }
  0x42   :  { %v267_v54 = vadd.f32 %v266_v43, %v265_v52  ;;  %v279_v55 = vrot.slane %v278_v28, 4 }
  0x44   :  { %v268_v56 = vrot.slane %v267_v54, 2  ;;  %v280_v46 = vadd.f32 %v279_v55, %v278_v28 }
  0x46   :  { %v281_v57 = vrot.slane %v280_v46, 2  ;;  %v269_v58 = vadd.f32 %v268_v56, %v267_v54 }
  0x48   :  { %v282_v59 = vadd.f32 %v281_v57, %v280_v46  ;;  %v270_v60 = vrot.slane %v269_v58, 1 }
  0x4a   :  { %v271_v62 = vadd.f32 %v270_v60, %v269_v58  ;;  %v283_v63 = vrot.slane %v282_v59, 1 }
  0x4c   :  { %v272_v7 = vadd.f32 %v271_v62, %v264_v61  ;;  %v284_v10 = vadd.f32 %v283_v63, %v282_v59 }
  0x4e   :  { %273 = vst [vmem:[%s490_s2] sm:$0x1] %v272_v7  ;;  %v285_v11 = vadd.f32 %v284_v10, %v274_v0 }
  0x50   :  { %286 = vst [vmem:[%s491_s3] sm:$0x1] %v285_v11 }

</bundles_post_ra>
